<compile_context>
chip_gen: v5e
topology: v5e:2x2
jax: 0.10.0
libtpu: 0.0.40
codegen_flags: <defaults>
</compile_context>

<pallas_src>
import functools
import math

import jax
import jax.numpy as jnp
from jax import lax
from jax.experimental import pallas as pl
from jax.experimental.pallas import tpu as pltpu


def _round_up(v, m):
    return (v + m - 1) // m * m


def _vmem_limit_bytes():
    """Per-generation VMEM budget with headroom for compiler temps."""
    cap = 128 * 1024 * 1024
    try:
        cap = int(pltpu.get_tpu_info().vmem_capacity_bytes)
    except Exception:
        pass
    # ~5/8 of physical per-core VMEM: ~40 MiB on v7x (64 MiB/TC), ~80 MiB on
    # v5e/v6e (128 MiB), capped at 96 MiB.
    return int(min(cap * 5 // 8, 96 * 1024 * 1024))


def _hat_weights(coord, true_size, rows):
    """1-D bilinear ("hat") weights along one axis.

    coord: [1, TN] normalized coords in [-1, 1] (align_corners=False).
    true_size: the ORIGINAL axis length (defines the coordinate mapping).
    rows: padded axis length (extra rows multiply zero-padded image data).
    returns: [rows, TN] f32.  Taps outside [0, true_size) either do not exist
             or hit zero-padded image columns, matching padding_mode='zeros'.
    """
    pix = (coord + 1.0) * (true_size * 0.5) - 0.5          # un-normalize
    idx = lax.broadcasted_iota(jnp.int32, (rows, coord.shape[-1]), 0)
    idx = idx.astype(jnp.float32)
    return jnp.maximum(0.0, 1.0 - jnp.abs(idx - pix))


def _dense_weights(cx, cy, H, W, Hp, Wp):
    """Dense [Hp*Wp, TN] grid-sample weight (4 taps per column)."""
    wh = _hat_weights(cy, H, Hp)                           # [Hp, TN]
    ww = _hat_weights(cx, W, Wp)                           # [Wp, TN]
    # Outer product; Wp % 8 == 0 so the collapse is a free sublane split.
    return (wh[:, None, :] * ww[None, :, :]).reshape(Hp * Wp, cx.shape[-1])


def _sep_sample(x_rows, ck, cr, rows, K, Kp, R, Rp, out_dtype):
    """Separable sampling: MXU contraction over K, VPU weighted reduce over R.

    x_rows: [rows*Rp, Kp] (compute dtype); ck/cr: [1, TN] coords along the
    contracted / reduced axis.  Returns [rows, TN] in out_dtype.
    """
    wk = _hat_weights(ck, K, Kp)                           # [Kp, TN] f32
    wr = _hat_weights(cr, R, Rp)                           # [Rp, TN] f32
    t = jnp.dot(x_rows, wk.astype(x_rows.dtype),
                preferred_element_type=jnp.float32)        # [rows*Rp, TN] (MXU)
    t3 = t.reshape(rows, Rp, t.shape[-1])                  # free: Rp % 8 == 0
    return (t3 * wr[None]).sum(axis=1).astype(out_dtype)   # [rows, TN]  (VPU)


# --------------------------- kernels -----------------------------------------


def _dense_shared_kernel(tess_ref, x_ref, o_ref, *, H, W, Hp, Wp):
    # fixations is None, small image: one matmul with K = Hp*Wp.
    # tess_ref: [2, TN] f32 ; x_ref: [rows_chunk, Hp*Wp] ; o_ref: [rows_chunk, TN]
    wd = _dense_weights(tess_ref[0:1, :], tess_ref[1:2, :], H, W, Hp, Wp)
    o_ref[...] = jnp.dot(x_ref[...], wd.astype(x_ref.dtype),
                         preferred_element_type=jnp.float32).astype(o_ref.dtype)


def _dense_fix_kernel(fix_ref, tess_ref, x_ref, o_ref, *, Bt, H, W, Hp, Wp):
    # Per-batch fixation, small image.  Bt batch elements per grid step.
    # fix_ref: SMEM [2*Bp] ; tess_ref: [2, TN] ; x_ref: [Bt, C, Hp*Wp]
    # o_ref: [Bt, C, TN]
    bc = pl.program_id(0)

    def body(i, carry):
        gb = bc * Bt + i
        cx = tess_ref[0:1, :] + fix_ref[2 * gb]
        cy = tess_ref[1:2, :] + fix_ref[2 * gb + 1]
        wd = _dense_weights(cx, cy, H, W, Hp, Wp)
        o_ref[i] = jnp.dot(x_ref[i], wd.astype(x_ref.dtype),
                           preferred_element_type=jnp.float32).astype(o_ref.dtype)
        return carry

    lax.fori_loop(0, Bt, body, 0, unroll=True)


def _sep_shared_kernel(tess_ref, x_ref, o_ref, *, rows, K, Kp, R, Rp, k_is_w):
    # fixations is None, large image: contract max(H, W) on the MXU.
    # tess_ref: [2, TN] ; x_ref: [rows*Rp, Kp] ; o_ref: [rows, TN]
    cx = tess_ref[0:1, :]
    cy = tess_ref[1:2, :]
    ck, cr = (cx, cy) if k_is_w else (cy, cx)
    o_ref[...] = _sep_sample(x_ref[...], ck, cr, rows, K, Kp, R, Rp, o_ref.dtype)


def _sep_fix_kernel(fix_ref, tess_ref, x_ref, o_ref, *, Bt, C, K, Kp, R, Rp,
                    k_is_w):
    # Per-batch fixation, large image.  Bt batch elements per grid step.
    # fix_ref: SMEM [2*Bp] ; x_ref: [Bt, C*Rp, Kp] ; o_ref: [Bt, C, TN]
    bc = pl.program_id(0)

    def body(i, carry):
        gb = bc * Bt + i
        cx = tess_ref[0:1, :] + fix_ref[2 * gb]
        cy = tess_ref[1:2, :] + fix_ref[2 * gb + 1]
        ck, cr = (cx, cy) if k_is_w else (cy, cx)
        o_ref[i] = _sep_sample(x_ref[i], ck, cr, C, K, Kp, R, Rp, o_ref.dtype)
        return carry

    lax.fori_loop(0, Bt, body, 0, unroll=True)


# --------------------------- host wrapper -------------------------------------


def light_retina(x_nchw, tessellation, fixations=None, *,
                 compute_dtype=jnp.bfloat16, out_dtype=jnp.float32,
                 dense_k_threshold=2048):
    """Pallas LightRetina.forward (bilinear grid_sample, zeros padding).

    x_nchw:       [B, C, H, W]
    tessellation: [N, 2] normalized (x, y) coords in [-1, 1]
    fixations:    optional [B, 2] offsets added to every tessellation coord
    returns:      [B, C, N] in out_dtype (float32 by default; bf16 allowed
                  to halve output HBM traffic, e.g. on v5e)
    """
    B, C, H, W = map(int, x_nchw.shape)
    N = int(tessellation.shape[0])

    # Lane-dense N tiling: always pad up to the target tile (<= 512).
    tn = min(512, _round_up(N, 128))
    n_pad = _round_up(N, tn)
    n_tiles = n_pad // tn

    # Coords as [2, n_pad] (sublane = x/y, lane = N): weights are built
    # natively in [size, N] orientation (no in-kernel transpose).
    tess_t = jnp.asarray(tessellation, jnp.float32).T            # [2, N]
    tess_t = jnp.pad(tess_t, ((0, 0), (0, n_pad - N)))           # [2, n_pad]

    vmem_limit = _vmem_limit_bytes()
    chunk_budget = max(2 * 1024 * 1024, vmem_limit // 8)

    cparams = pltpu.CompilerParams(
        dimension_semantics=("parallel", "parallel"),
        vmem_limit_bytes=vmem_limit)

    x = jnp.asarray(x_nchw).astype(compute_dtype)

    # Dense-path geometry: Wp multiple of 8 (free weight reshape), Hp chosen so
    # that Kd = Hp*Wp is a multiple of 128 (clean MXU contraction / vld layout).
    Wp = _round_up(W, 8)
    Hp = _round_up(H, 128 // math.gcd(Wp, 128))
    Kd = Hp * Wp
    use_dense = Kd <= dense_k_threshold

    if use_dense:
        # -------- dense single-matmul path (small images) --------
        x_p = jnp.pad(x, ((0, 0), (0, 0), (0, Hp - H), (0, Wp - W)))

        if fixations is None:
            rows_total = B * C
            x_flat = x_p.reshape(rows_total, Kd)                 # [B*C, Kd]
            per_row = Kd * 2 * 2 + tn * 4 * 2                    # img x2buf + out x2buf
            budget = max(chunk_budget - 2 * Kd * tn * 4, 1 << 20)
            rows_chunk = max(8, (budget // per_row) // 8 * 8)
            rows_chunk = min(rows_chunk, _round_up(rows_total, 8))
            bcp = _round_up(rows_total, rows_chunk)
            x_flat = jnp.pad(x_flat, ((0, bcp - rows_total), (0, 0)))
            out = pl.pallas_call(
                functools.partial(_dense_shared_kernel, H=H, W=W, Hp=Hp, Wp=Wp),
                out_shape=jax.ShapeDtypeStruct((bcp, n_pad), out_dtype),
                grid=(bcp // rows_chunk, n_tiles),
                in_specs=[
                    pl.BlockSpec((2, tn), lambda rc, nt: (0, nt)),
                    pl.BlockSpec((rows_chunk, Kd), lambda rc, nt: (rc, 0)),
                ],
                out_specs=pl.BlockSpec((rows_chunk, tn), lambda rc, nt: (rc, nt)),
                compiler_params=cparams,
            )(tess_t, x_flat)
            return out[:rows_total].reshape(B, C, n_pad)[:, :, :N]

        # Fixation path: Bt batch elements per grid step.
        fix = jnp.asarray(fixations, jnp.float32).reshape(-1)    # [2B] interleaved
        x_b = x_p.reshape(B, C, Kd)
        per_b = C * Kd * 2 * 2 + Kd * tn * 4 + C * tn * 4 * 2
        Bt = max(1, min(B, chunk_budget // per_b, 8))
        Bp = _round_up(B, Bt)
        x_b = jnp.pad(x_b, ((0, Bp - B), (0, 0), (0, 0)))
        fix = jnp.pad(fix, (0, 2 * (Bp - B)))
        out = pl.pallas_call(
            functools.partial(_dense_fix_kernel, Bt=Bt, H=H, W=W, Hp=Hp, Wp=Wp),
            out_shape=jax.ShapeDtypeStruct((Bp, C, n_pad), out_dtype),
            grid=(Bp // Bt, n_tiles),
            in_specs=[
                pl.BlockSpec(memory_space=pltpu.MemorySpace.SMEM),   # fixations
                pl.BlockSpec((2, tn), lambda bc, nt: (0, nt)),       # tess
                pl.BlockSpec((Bt, C, Kd), lambda bc, nt: (bc, 0, 0)),  # image
            ],
            out_specs=pl.BlockSpec((Bt, C, tn), lambda bc, nt: (bc, 0, nt)),
            compiler_params=cparams,
        )(fix, tess_t, x_b)
        return out[:B, :, :N]

    # -------- separable path (large images): contract max(H, W) on the MXU ----
    k_is_w = W >= H
    if k_is_w:
        K, R = W, H
        x_perm = x                                       # [B, C, R=H, K=W]
    else:
        K, R = H, W
        x_perm = jnp.swapaxes(x, -1, -2)                 # [B, C, R=W, K=H]
    Kp = _round_up(K, 128)                               # MXU contraction dim
    Rp = _round_up(R, 8)                                 # VPU reduce dim (free reshape)
    x_perm = jnp.pad(x_perm, ((0, 0), (0, 0), (0, Rp - R), (0, Kp - K)))

    if fixations is None:
        rows_total = B * C
        per_row = Rp * Kp * 2 * 2 + Rp * tn * 4 + tn * 4 * 2
        rows_chunk = max(8, (chunk_budget // per_row) // 8 * 8)
        rows_chunk = min(rows_chunk, _round_up(rows_total, 8))
        bcp = _round_up(rows_total, rows_chunk)
        x3 = x_perm.reshape(rows_total, Rp, Kp)
        x3 = jnp.pad(x3, ((0, bcp - rows_total), (0, 0), (0, 0)))
        x_rows = x3.reshape(bcp * Rp, Kp)
        out = pl.pallas_call(
            functools.partial(_sep_shared_kernel, rows=rows_chunk,
                              K=K, Kp=Kp, R=R, Rp=Rp, k_is_w=k_is_w),
            out_shape=jax.ShapeDtypeStruct((bcp, n_pad), out_dtype),
            grid=(bcp // rows_chunk, n_tiles),
            in_specs=[
                pl.BlockSpec((2, tn), lambda rc, nt: (0, nt)),
                pl.BlockSpec((rows_chunk * Rp, Kp), lambda rc, nt: (rc, 0)),
            ],
            out_specs=pl.BlockSpec((rows_chunk, tn), lambda rc, nt: (rc, nt)),
            compiler_params=cparams,
        )(tess_t, x_rows)
        return out[:rows_total].reshape(B, C, n_pad)[:, :, :N]

    fix = jnp.asarray(fixations, jnp.float32).reshape(-1)        # [2B]
    x_b = x_perm.reshape(B, C * Rp, Kp)
    per_b = (C * Rp * Kp * 2 * 2 + C * Rp * tn * 4
             + (Kp + Rp) * tn * 4 + C * tn * 4 * 2)
    Bt = max(1, min(B, chunk_budget // per_b, 8))
    Bp = _round_up(B, Bt)
    x_b = jnp.pad(x_b, ((0, Bp - B), (0, 0), (0, 0)))
    fix = jnp.pad(fix, (0, 2 * (Bp - B)))
    out = pl.pallas_call(
        functools.partial(_sep_fix_kernel, Bt=Bt, C=C,
                          K=K, Kp=Kp, R=R, Rp=Rp, k_is_w=k_is_w),
        out_shape=jax.ShapeDtypeStruct((Bp, C, n_pad), out_dtype),
        grid=(Bp // Bt, n_tiles),
        in_specs=[
            pl.BlockSpec(memory_space=pltpu.MemorySpace.SMEM),       # fixations
            pl.BlockSpec((2, tn), lambda bc, nt: (0, nt)),           # tess
            pl.BlockSpec((Bt, C * Rp, Kp), lambda bc, nt: (bc, 0, 0)),  # image
        ],
        out_specs=pl.BlockSpec((Bt, C, tn), lambda bc, nt: (bc, 0, nt)),
        compiler_params=cparams,
    )(fix, tess_t, x_b)
    return out[:B, :, :N]


# --------------------------- pure-JAX reference -------------------------------


def _grid_sample_ref(x, coords):
    """bilinear grid_sample, zeros padding, align_corners=False.
    x: [B, C, H, W] f32 ; coords: [B, N, 2] (x, y) in [-1, 1] -> [B, C, N]."""
    B, C, H, W = x.shape
    ix = (coords[..., 0] + 1.0) * (W * 0.5) - 0.5    # [B, N]
    iy = (coords[..., 1] + 1.0) * (H * 0.5) - 0.5
    x0 = jnp.floor(ix)
    y0 = jnp.floor(iy)
    wx = ix - x0
    wy = iy - y0
    x0i = x0.astype(jnp.int32)
    y0i = y0.astype(jnp.int32)

    def tap(xi, yi, w):
        valid = ((xi >= 0) & (xi < W) & (yi >= 0) & (yi < H)).astype(x.dtype)
        xc = jnp.clip(xi, 0, W - 1)
        yc = jnp.clip(yi, 0, H - 1)
        vals = jax.vmap(lambda img, yy, xx: img[:, yy, xx])(x, yc, xc)  # [B,C,N]
        return vals * (w * valid)[:, None, :]

    return (tap(x0i,     y0i,     (1 - wx) * (1 - wy))
            + tap(x0i + 1, y0i,     wx       * (1 - wy))
            + tap(x0i,     y0i + 1, (1 - wx) * wy)
            + tap(x0i + 1, y0i + 1, wx       * wy))


if __name__ == "__main__":
    key = jax.random.PRNGKey(0)
    k_x, k_t, k_f, k_x2, k_t2, k_f2 = jax.random.split(key, 6)

    # ---- small square image: dense single-matmul fast path (K = H*W) ----
    B, C, H, W, N = 2, 4, 16, 16, 8
    x = jax.random.normal(k_x, (B, C, H, W), dtype=jnp.float32)
    tess = jax.random.uniform(k_t, (N, 2), minval=-0.8, maxval=0.8,
                              dtype=jnp.float32)
    fix = jax.random.uniform(k_f, (B, 2), minval=-0.3, maxval=0.3,
                             dtype=jnp.float32)

    out = light_retina(x, tess, fix)                       # dense, fixation path
    jax.block_until_ready(out)
    assert out.shape == (B, C, N), out.shape
    ref = _grid_sample_ref(x, tess[None] + fix[:, None, :])
    err = float(jnp.max(jnp.abs(out - ref)))
    assert err < 5e-2, err                                 # bf16 MXU, f32 acc

    out = light_retina(x, tess, None)                      # dense, shared path
    jax.block_until_ready(out)
    assert out.shape == (B, C, N), out.shape
    ref = _grid_sample_ref(x, jnp.broadcast_to(tess[None], (B, N, 2)))
    err = float(jnp.max(jnp.abs(out - ref)))
    assert err < 5e-2, err

    # ---- non-square (H > W), forced separable path: MXU contracts H ----
    B2, C2, H2, W2, N2 = 2, 3, 16, 12, 33
    x2 = jax.random.normal(k_x2, (B2, C2, H2, W2), dtype=jnp.float32)
    tess2 = jax.random.uniform(k_t2, (N2, 2), minval=-0.9, maxval=0.9,
                               dtype=jnp.float32)
    fix2 = jax.random.uniform(k_f2, (B2, 2), minval=-0.3, maxval=0.3,
                              dtype=jnp.float32)

    out2 = light_retina(x2, tess2, fix2, dense_k_threshold=0)   # separable, fix
    jax.block_until_ready(out2)
    assert out2.shape == (B2, C2, N2), out2.shape
    ref2 = _grid_sample_ref(x2, tess2[None] + fix2[:, None, :])
    err2 = float(jnp.max(jnp.abs(out2 - ref2)))
    assert err2 < 5e-2, err2

    out2 = light_retina(x2, tess2, None, dense_k_threshold=0)   # separable, shared
    jax.block_until_ready(out2)
    assert out2.shape == (B2, C2, N2), out2.shape
    ref2 = _grid_sample_ref(x2, jnp.broadcast_to(tess2[None], (B2, N2, 2)))
    err2 = float(jnp.max(jnp.abs(out2 - ref2)))
    assert err2 < 5e-2, err2

    print("KERNEL_OK")
</pallas_src>

<mosaic_0001>
module attributes {stable_mosaic.version = 11 : i64} {
  func.func @_dense_fix_kernel(%arg0: i32, %arg1: i32, %arg2: memref<4xf32, #tpu.memory_space<smem>>, %arg3: memref<2x128xf32, #tpu.memory_space<vmem>>, %arg4: memref<2x4x256xbf16, #tpu.memory_space<vmem>>, %arg5: memref<2x4x128xf32, #tpu.memory_space<vmem>>) attributes {dimension_semantics = [#tpu.dimension_semantics<parallel>, #tpu.dimension_semantics<parallel>], iteration_bounds = array<i64: 1, 1>, scalar_prefetch = 0 : i64, scratch_operands = 0 : i64, tpu.core_type = #tpu.core_type<tc>, window_params = [{transform_indices = @transform_0, window_bounds = array<i64: 4>}, {transform_indices = @transform_1, window_bounds = array<i64: 2, 128>}, {transform_indices = @transform_2, window_bounds = array<i64: 2, 4, 256>}, {transform_indices = @transform_3, window_bounds = array<i64: 2, 4, 128>}]} {
    %c0_i32 = arith.constant 0 : i32
    %c2_i32 = arith.constant 2 : i32
    %0 = arith.muli %arg0, %c2_i32 : i32
    %1 = arith.addi %0, %c0_i32 : i32
    %c0 = arith.constant 0 : index
    %c0_0 = arith.constant 0 : index
    %2 = vector.load %arg3[%c0, %c0_0] : memref<2x128xf32, #tpu.memory_space<vmem>>, vector<1x128xf32>
    %c2_i32_1 = arith.constant 2 : i32
    %3 = arith.muli %c2_i32_1, %1 : i32
    %4 = arith.index_cast %3 : i32 to index
    %5 = memref.load %arg2[%4] : memref<4xf32, #tpu.memory_space<smem>>
    %6 = vector.broadcast %5 : f32 to vector<1x128xf32>
    %7 = arith.addf %2, %6 : vector<1x128xf32>
    %c1 = arith.constant 1 : index
    %c0_2 = arith.constant 0 : index
    %8 = vector.load %arg3[%c1, %c0_2] : memref<2x128xf32, #tpu.memory_space<vmem>>, vector<1x128xf32>
    %c2_i32_3 = arith.constant 2 : i32
    %9 = arith.muli %c2_i32_3, %1 : i32
    %c1_i32 = arith.constant 1 : i32
    %10 = arith.addi %9, %c1_i32 : i32
    %11 = arith.index_cast %10 : i32 to index
    %12 = memref.load %arg2[%11] : memref<4xf32, #tpu.memory_space<smem>>
    %13 = vector.broadcast %12 : f32 to vector<1x128xf32>
    %14 = arith.addf %8, %13 : vector<1x128xf32>
    %cst = arith.constant 1.000000e+00 : f32
    %15 = vector.broadcast %cst : f32 to vector<1x128xf32>
    %16 = arith.addf %14, %15 : vector<1x128xf32>
    %cst_4 = arith.constant 8.000000e+00 : f32
    %17 = vector.broadcast %cst_4 : f32 to vector<1x128xf32>
    %18 = arith.mulf %16, %17 : vector<1x128xf32>
    %cst_5 = arith.constant 5.000000e-01 : f32
    %19 = vector.broadcast %cst_5 : f32 to vector<1x128xf32>
    %20 = arith.subf %18, %19 : vector<1x128xf32>
    %21 = tpu.iota {dimensions = array<i32: 0>} : vector<16x128xi32>
    %22 = arith.sitofp %21 : vector<16x128xi32> to vector<16x128xf32>
    %23 = vector.broadcast %20 : vector<1x128xf32> to vector<16x128xf32>
    %24 = arith.subf %22, %23 : vector<16x128xf32>
    %25 = math.absf %24 : vector<16x128xf32>
    %cst_6 = arith.constant 1.000000e+00 : f32
    %26 = vector.broadcast %cst_6 : f32 to vector<16x128xf32>
    %27 = arith.subf %26, %25 : vector<16x128xf32>
    %cst_7 = arith.constant 0.000000e+00 : f32
    %28 = vector.broadcast %cst_7 : f32 to vector<16x128xf32>
    %29 = arith.maximumf %28, %27 : vector<16x128xf32>
    %cst_8 = arith.constant 1.000000e+00 : f32
    %30 = vector.broadcast %cst_8 : f32 to vector<1x128xf32>
    %31 = arith.addf %7, %30 : vector<1x128xf32>
    %cst_9 = arith.constant 8.000000e+00 : f32
    %32 = vector.broadcast %cst_9 : f32 to vector<1x128xf32>
    %33 = arith.mulf %31, %32 : vector<1x128xf32>
    %cst_10 = arith.constant 5.000000e-01 : f32
    %34 = vector.broadcast %cst_10 : f32 to vector<1x128xf32>
    %35 = arith.subf %33, %34 : vector<1x128xf32>
    %36 = tpu.iota {dimensions = array<i32: 0>} : vector<16x128xi32>
    %37 = arith.sitofp %36 : vector<16x128xi32> to vector<16x128xf32>
    %38 = vector.broadcast %35 : vector<1x128xf32> to vector<16x128xf32>
    %39 = arith.subf %37, %38 : vector<16x128xf32>
    %40 = math.absf %39 : vector<16x128xf32>
    %cst_11 = arith.constant 1.000000e+00 : f32
    %41 = vector.broadcast %cst_11 : f32 to vector<16x128xf32>
    %42 = arith.subf %41, %40 : vector<16x128xf32>
    %cst_12 = arith.constant 0.000000e+00 : f32
    %43 = vector.broadcast %cst_12 : f32 to vector<16x128xf32>
    %44 = arith.maximumf %43, %42 : vector<16x128xf32>
    %45 = vector.shape_cast %29 : vector<16x128xf32> to vector<16x1x128xf32>
    %46 = vector.shape_cast %44 : vector<16x128xf32> to vector<1x16x128xf32>
    %47 = vector.broadcast %45 : vector<16x1x128xf32> to vector<16x16x128xf32>
    %48 = vector.broadcast %46 : vector<1x16x128xf32> to vector<16x16x128xf32>
    %49 = arith.mulf %47, %48 : vector<16x16x128xf32>
    %50 = vector.shape_cast %49 : vector<16x16x128xf32> to vector<256x128xf32>
    %51 = arith.index_cast %c0_i32 : i32 to index
    %c0_13 = arith.constant 0 : index
    %c0_14 = arith.constant 0 : index
    %52 = vector.load %arg4[%51, %c0_13, %c0_14] : memref<2x4x256xbf16, #tpu.memory_space<vmem>>, vector<1x4x256xbf16>
    %53 = vector.shape_cast %52 : vector<1x4x256xbf16> to vector<4x256xbf16>
    %54 = arith.truncf %50 : vector<256x128xf32> to vector<256x128xbf16>
    %cst_15 = arith.constant dense<0.000000e+00> : vector<4x128xf32>
    %55 = tpu.matmul %53, %54, %cst_15 {dimension_numbers = #tpu.dot_dimension_numbers<[1], [0], [0], [1], [0, 0, 1, 1], [], []>} : vector<4x256xbf16>, vector<256x128xbf16>, vector<4x128xf32> -> vector<4x128xf32>
    %56 = arith.index_cast %c0_i32 : i32 to index
    %c0_16 = arith.constant 0 : index
    %c0_17 = arith.constant 0 : index
    %57 = vector.load %arg5[%56, %c0_16, %c0_17] : memref<2x4x128xf32, #tpu.memory_space<vmem>>, vector<1x4x128xf32>
    %58 = vector.shape_cast %57 : vector<1x4x128xf32> to vector<4x128xf32>
    %59 = vector.shape_cast %55 : vector<4x128xf32> to vector<1x4x128xf32>
    tpu.vector_store %arg5[%56, %c0_16, %c0_17], %59 {strides = array<i32>} : memref<2x4x128xf32, #tpu.memory_space<vmem>>, vector<1x4x128xf32>,
    %c1_i32_18 = arith.constant 1 : i32
    %c2_i32_19 = arith.constant 2 : i32
    %60 = arith.muli %arg0, %c2_i32_19 : i32
    %61 = arith.addi %60, %c1_i32_18 : i32
    %c0_20 = arith.constant 0 : index
    %c0_21 = arith.constant 0 : index
    %62 = vector.load %arg3[%c0_20, %c0_21] : memref<2x128xf32, #tpu.memory_space<vmem>>, vector<1x128xf32>
    %c2_i32_22 = arith.constant 2 : i32
    %63 = arith.muli %c2_i32_22, %61 : i32
    %64 = arith.index_cast %63 : i32 to index
    %65 = memref.load %arg2[%64] : memref<4xf32, #tpu.memory_space<smem>>
    %66 = vector.broadcast %65 : f32 to vector<1x128xf32>
    %67 = arith.addf %62, %66 : vector<1x128xf32>
    %c1_23 = arith.constant 1 : index
    %c0_24 = arith.constant 0 : index
    %68 = vector.load %arg3[%c1_23, %c0_24] : memref<2x128xf32, #tpu.memory_space<vmem>>, vector<1x128xf32>
    %c2_i32_25 = arith.constant 2 : i32
    %69 = arith.muli %c2_i32_25, %61 : i32
    %c1_i32_26 = arith.constant 1 : i32
    %70 = arith.addi %69, %c1_i32_26 : i32
    %71 = arith.index_cast %70 : i32 to index
    %72 = memref.load %arg2[%71] : memref<4xf32, #tpu.memory_space<smem>>
    %73 = vector.broadcast %72 : f32 to vector<1x128xf32>
    %74 = arith.addf %68, %73 : vector<1x128xf32>
    %cst_27 = arith.constant 1.000000e+00 : f32
    %75 = vector.broadcast %cst_27 : f32 to vector<1x128xf32>
    %76 = arith.addf %74, %75 : vector<1x128xf32>
    %cst_28 = arith.constant 8.000000e+00 : f32
    %77 = vector.broadcast %cst_28 : f32 to vector<1x128xf32>
    %78 = arith.mulf %76, %77 : vector<1x128xf32>
    %cst_29 = arith.constant 5.000000e-01 : f32
    %79 = vector.broadcast %cst_29 : f32 to vector<1x128xf32>
    %80 = arith.subf %78, %79 : vector<1x128xf32>
    %81 = tpu.iota {dimensions = array<i32: 0>} : vector<16x128xi32>
    %82 = arith.sitofp %81 : vector<16x128xi32> to vector<16x128xf32>
    %83 = vector.broadcast %80 : vector<1x128xf32> to vector<16x128xf32>
    %84 = arith.subf %82, %83 : vector<16x128xf32>
    %85 = math.absf %84 : vector<16x128xf32>
    %cst_30 = arith.constant 1.000000e+00 : f32
    %86 = vector.broadcast %cst_30 : f32 to vector<16x128xf32>
    %87 = arith.subf %86, %85 : vector<16x128xf32>
    %cst_31 = arith.constant 0.000000e+00 : f32
    %88 = vector.broadcast %cst_31 : f32 to vector<16x128xf32>
    %89 = arith.maximumf %88, %87 : vector<16x128xf32>
    %cst_32 = arith.constant 1.000000e+00 : f32
    %90 = vector.broadcast %cst_32 : f32 to vector<1x128xf32>
    %91 = arith.addf %67, %90 : vector<1x128xf32>
    %cst_33 = arith.constant 8.000000e+00 : f32
    %92 = vector.broadcast %cst_33 : f32 to vector<1x128xf32>
    %93 = arith.mulf %91, %92 : vector<1x128xf32>
    %cst_34 = arith.constant 5.000000e-01 : f32
    %94 = vector.broadcast %cst_34 : f32 to vector<1x128xf32>
    %95 = arith.subf %93, %94 : vector<1x128xf32>
    %96 = tpu.iota {dimensions = array<i32: 0>} : vector<16x128xi32>
    %97 = arith.sitofp %96 : vector<16x128xi32> to vector<16x128xf32>
    %98 = vector.broadcast %95 : vector<1x128xf32> to vector<16x128xf32>
    %99 = arith.subf %97, %98 : vector<16x128xf32>
    %100 = math.absf %99 : vector<16x128xf32>
    %cst_35 = arith.constant 1.000000e+00 : f32
    %101 = vector.broadcast %cst_35 : f32 to vector<16x128xf32>
    %102 = arith.subf %101, %100 : vector<16x128xf32>
    %cst_36 = arith.constant 0.000000e+00 : f32
    %103 = vector.broadcast %cst_36 : f32 to vector<16x128xf32>
    %104 = arith.maximumf %103, %102 : vector<16x128xf32>
    %105 = vector.shape_cast %89 : vector<16x128xf32> to vector<16x1x128xf32>
    %106 = vector.shape_cast %104 : vector<16x128xf32> to vector<1x16x128xf32>
    %107 = vector.broadcast %105 : vector<16x1x128xf32> to vector<16x16x128xf32>
    %108 = vector.broadcast %106 : vector<1x16x128xf32> to vector<16x16x128xf32>
    %109 = arith.mulf %107, %108 : vector<16x16x128xf32>
    %110 = vector.shape_cast %109 : vector<16x16x128xf32> to vector<256x128xf32>
    %111 = arith.index_cast %c1_i32_18 : i32 to index
    %c0_37 = arith.constant 0 : index
    %c0_38 = arith.constant 0 : index
    %112 = vector.load %arg4[%111, %c0_37, %c0_38] : memref<2x4x256xbf16, #tpu.memory_space<vmem>>, vector<1x4x256xbf16>
    %113 = vector.shape_cast %112 : vector<1x4x256xbf16> to vector<4x256xbf16>
    %114 = arith.truncf %110 : vector<256x128xf32> to vector<256x128xbf16>
    %cst_39 = arith.constant dense<0.000000e+00> : vector<4x128xf32>
    %115 = tpu.matmul %113, %114, %cst_39 {dimension_numbers = #tpu.dot_dimension_numbers<[1], [0], [0], [1], [0, 0, 1, 1], [], []>} : vector<4x256xbf16>, vector<256x128xbf16>, vector<4x128xf32> -> vector<4x128xf32>
    %116 = arith.index_cast %c1_i32_18 : i32 to index
    %c0_40 = arith.constant 0 : index
    %c0_41 = arith.constant 0 : index
    %117 = vector.load %arg5[%116, %c0_40, %c0_41] : memref<2x4x128xf32, #tpu.memory_space<vmem>>, vector<1x4x128xf32>
    %118 = vector.shape_cast %117 : vector<1x4x128xf32> to vector<4x128xf32>
    %119 = vector.shape_cast %115 : vector<4x128xf32> to vector<1x4x128xf32>
    tpu.vector_store %arg5[%116, %c0_40, %c0_41], %119 {strides = array<i32>} : memref<2x4x128xf32, #tpu.memory_space<vmem>>, vector<1x4x128xf32>,
    %c2_i32_42 = arith.constant 2 : i32
    return
  }
  func.func @transform_0(%arg0: i32, %arg1: i32) -> i32 {
    %c0_i32 = arith.constant 0 : i32
    %c0_i32_0 = arith.constant 0 : i32
    return %c0_i32 : i32
  }
  func.func @transform_1(%arg0: i32, %arg1: i32) -> (i32, i32) {
    %c0_i32 = arith.constant 0 : i32
    %c0_i32_0 = arith.constant 0 : i32
    return %c0_i32, %arg1 : i32, i32
  }
  func.func @transform_2(%arg0: i32, %arg1: i32) -> (i32, i32, i32) {
    %c0_i32 = arith.constant 0 : i32
    %c0_i32_0 = arith.constant 0 : i32
    %c0_i32_1 = arith.constant 0 : i32
    return %arg0, %c0_i32, %c0_i32_0 : i32, i32, i32
  }
  func.func @transform_3(%arg0: i32, %arg1: i32) -> (i32, i32, i32) {
    %c0_i32 = arith.constant 0 : i32
    %c0_i32_0 = arith.constant 0 : i32
    return %arg0, %c0_i32, %arg1 : i32, i32, i32
  }
}

</mosaic_0001>

<bundles_post_ra>
// kernel: tpu_custom_call.1
= control target key start
LH: loop header
LB: loop body
LE: loop exit
PB: predicated region body
PF: predicated region fallthrough
CT: control target
= control target key end

     0   :  { %8 = vsyncpa [#allocation5], 0  ;;  %s683_s0 = inlined_call_operand.hbm [shape: f32[4], index: 0, kind: input, shape index: {}]   ;;  %s684_s1 = inlined_call_operand.hbm [shape: f32[2,128], index: 1, kind: input, shape index: {}]   ;;  %s685_s2 = inlined_call_operand.hbm [shape: bf16[2,4,256], index: 2, kind: input, shape index: {}]   ;;  %s686_s3 = inlined_call_operand.hbm [shape: f32[2,4,128], index: 3, kind: output, shape index: {}]  }
   0x1   :  { %9 = vsyncpa [#allocation3], 0 }
   0x2   :  { %10 = vsyncpa [#allocation8], 0 }
   0x3   :  { %11 = vsyncpa [#allocation4], 0  ;;  %s17_s14 = sshll.u32 %s683_s0, 4  ;;  %s26_s17 = sshll.u32 %s684_s1, 4  ;;  %s18_s14 = int_to_ptr.hbm [resolvable:$true] %s17_s14  ;;  %s27_s17 = int_to_ptr.hbm [resolvable:$true] %s26_s17 }
   0x4   :  { %s521_s18 = smov [#allocation2]   ;;  %s522_s19 = smov [#allocation6]  }
   0x5   :  { %20 = dma.hbm_to_smem %s18_s14, 16, %s521_s18, [#allocation5]  }
   0x6   :  { %s28_s20 = sshll.u32 %s522_s19, 4  ;;  %s36_s23 = sshll.u32 %s685_s2, 4  ;;  %s29_s20 = int_to_ptr.vmem [resolvable:$true] %s28_s20  ;;  %s37_s23 = int_to_ptr.hbm [resolvable:$true] %s36_s23 }
   0x7   :  { %31 = dma.hbm_to_vmem [thread:$0]  %s27_s17, 32, %s29_s20, [#allocation3]  }
   0x8   :  { %s523_s24 = smov [#allocation7]   ;;  %s524_s0 = smov 64  }
   0x9   :  { %s38_s25 = sshll.u32 %s523_s24, 4  ;;  %s525_s26 = smov 4   ;;  %s39_s25 = int_to_ptr.vmem [resolvable:$true] %s38_s25 }
   0xa   :  { %44 = dma.hbm_to_vmem [thread:$0]  %s37_s23, 128, %s39_s25, [#allocation8], %s524_s0, %s524_s0, %s525_s26  }
   0xb   :  { %513 = dma.done.wait [#allocation5], 16  }
   0xc   :  { %514 = vsyncadd [#allocation5], 4294967280 }
   0xd   :  { %515 = dma.done.wait [#allocation3], 32  }
   0xe   :  { %516 = vsyncadd [#allocation3], 4294967264 }
   0xf   :  { %517 = dma.done.wait [#allocation8], 128  }
  0x10   :  { %518 = vsyncadd [#allocation8], 4294967168 }
  0x11   :  { %57 = sfence }
  0x12   :  { %s60_s1 = sld [smem:[#allocation2]]  ;;  %v71_v0 = vlaneseq  ;;  %v58_v1 = vld [vmem:[#allocation6] sm:$0x1]  ;;  %v63_v2 = vld [vmem:[#allocation6 + $0x1] sm:$0x1]  ;;  %s526_s29 = smov [#allocation9]  }
  0x13   :  { %s416_s2 = sld [smem:[#allocation2 + $0x1]]  ;;  %v229_v5 = vld [vmem:[#allocation6] sm:$0x1]  ;;  %v234_v8 = vld [vmem:[#allocation6 + $0x1] sm:$0x1]  ;;  %s399_s30 = sshll.u32 %s526_s29, 4  ;;  %s400_s30 = int_to_ptr.vmem [resolvable:$true] %s399_s30 }
  0x14   :  { %s419_s27 = sld [smem:[#allocation2 + $0x2]]  ;;  %v72_v4 = vshrl.u32 %v71_v0, 7  ;;  %v177_v55 = vld [vmem:[#allocation7] sm:$0xf]  ;;  %s401_s6 = sshll.u32 %s686_s3, 4  ;;  %s402_s6 = int_to_ptr.hbm [resolvable:$true] %s401_s6 }
  0x15   :  { %s420_s28 = sld [smem:[#allocation2 + $0x3]]  ;;  %195 = vst [vmem:[#allocation1] ss:$4 sm:$0xff] %v177_v55 }
  0x16   :  { %v73_v15 = vadd.s32 8, %v72_v4  ;;  %v74_v24 = vcvt.s32.f32 %v72_v4 }
  0x18   :  { %v61_v3 = vstv %s60_s1  ;;  %v75_v25 = vcvt.s32.f32 %v73_v15 }
  0x19   :  { %v62_v6 = vadd.f32 %v61_v3, %v58_v1  ;;  %v66_v7 = vstv %s416_s2 }
  0x1a   :  { %v67_v9 = vadd.f32 %v66_v7, %v63_v2  ;;  %v232_v10 = vstv %s419_s27 }
  0x1b   :  { %v85_v11 = vadd.f32 1.0, %v62_v6  ;;  %v233_v12 = vadd.f32 %v232_v10, %v229_v5  ;;  %v237_v13 = vstv %s420_s28 }
  0x1c   :  { %v68_v14 = vadd.f32 1.0, %v67_v9  ;;  %v238_v16 = vadd.f32 %v237_v13, %v234_v8 }
  0x1d   :  { %v86_v17 = vmul.f32 8.0, %v85_v11  ;;  %v251_v18 = vadd.f32 1.0, %v233_v12 }
  0x1e   :  { %v69_v19 = vmul.f32 8.0, %v68_v14  ;;  %v239_v20 = vadd.f32 1.0, %v238_v16 }
  0x1f   :  { %v418_v21 = vadd.f32 -0.5, %v86_v17  ;;  %v252_v22 = vmul.f32 8.0, %v251_v18 }
  0x20   :  { %v417_v23 = vadd.f32 -0.5, %v69_v19  ;;  %v240_v26 = vmul.f32 8.0, %v239_v20 }
  0x21   :  { %v88_v27 = vperm.slane %v418_v21, 0  ;;  %v422_v28 = vadd.f32 -0.5, %v252_v22 }
  0x22   :  { %v76_v29 = vperm.slane %v417_v23, 0  ;;  %v421_v30 = vadd.f32 -0.5, %v240_v26 }
  0x23   :  { %v89_v31 = vsub.f32 %v74_v24, %v88_v27  ;;  %v90_v32 = vsub.f32 %v75_v25, %v88_v27  ;;  %v254_v33 = vperm.slane %v422_v28, 0 }
  0x24   :  { %v77_v34 = vsub.f32 %v74_v24, %v76_v29  ;;  %v78_v35 = vsub.f32 %v75_v25, %v76_v29  ;;  %v242_v36 = vperm.slane %v421_v30, 0  ;;  %v595_v29 = vld.sshfl [vmem:[#allocation1 + $0x8] sm:$0xff pattern:$0x73625140] }
  0x25   :  { %v91_v37 = vand.u32 2147483647, %v89_v31  ;;  %v92_v38 = vand.u32 2147483647, %v90_v32  ;;  %v255_v39 = vsub.f32 %v74_v24, %v254_v33  ;;  %v256_v40 = vsub.f32 %v75_v25, %v254_v33  ;;  %v344_v30 = vld [vmem:[#allocation7 + $0x4] sm:$0xf] }
  0x26   :  { %v79_v41 = vand.u32 2147483647, %v77_v34  ;;  %v80_v42 = vand.u32 2147483647, %v78_v35  ;;  %v243_v43 = vsub.f32 %v74_v24, %v242_v36  ;;  %v244_v44 = vsub.f32 %v75_v25, %v242_v36 }
  0x27   :  { %v93_v45 = vsub.f32 1.0, %v91_v37  ;;  %v94_v46 = vsub.f32 1.0, %v92_v38  ;;  %v257_v47 = vand.u32 2147483647, %v255_v39  ;;  %v258_v48 = vand.u32 2147483647, %v256_v40 }
  0x28   :  { %v81_v49 = vsub.f32 1.0, %v79_v41  ;;  %v82_v50 = vsub.f32 1.0, %v80_v42  ;;  %v245_v51 = vand.u32 2147483647, %v243_v43  ;;  %v246_v52 = vand.u32 2147483647, %v244_v44 }
  0x29   :  { %v259_v53 = vsub.f32 1.0, %v257_v47  ;;  %v260_v54 = vsub.f32 1.0, %v258_v48  ;;  %v563_v60 = vmax.f32 %v93_v45, 0.0  ;;  %v565_v61 = vmax.f32 %v94_v46, 0.0 }
  0x2a   :  { %v559_v56 = vmax.f32 %v81_v49, 0.0  ;;  %v561_v57 = vmax.f32 %v82_v50, 0.0  ;;  %v247_v58 = vsub.f32 1.0, %v245_v51  ;;  %v248_v59 = vsub.f32 1.0, %v246_v52 }
  0x2b   :  { %v567_v62 = vmax.f32 %v259_v53, 0.0  ;;  %v569_v63 = vmax.f32 %v260_v54, 0.0  ;;  %v591_v24 = vld.sshfl [vmem:[#allocation1] sm:$0xff pattern:$0x73625140] }
  0x2c   :  { %v105_v0 = vrot.slane %v559_v56, 7  ;;  %v112_v1 = vrot.slane %v561_v57, 7  ;;  %v573_v2 = vmax.f32 %v247_v58, 0.0  ;;  %v575_v3 = vmax.f32 %v248_v59, 0.0  ;;  %362 = vst [vmem:[#allocation1] ss:$4 sm:$0xff] %v344_v30 }
  0x2d   :  { %v104_v4 = vrot.slane %v559_v56, 6  ;;  %v111_v5 = vrot.slane %v561_v57, 6  ;;  %v103_v6 = vrot.slane %v559_v56, 5  ;;  %v110_v7 = vrot.slane %v561_v57, 5 }
  0x2e   :  { %v120_v8 = vperm.slane %v105_v0, 0  ;;  %v128_v9 = vperm.slane %v112_v1, 0  ;;  %v271_v10 = vrot.slane %v573_v2, 7  ;;  %v278_v11 = vrot.slane %v575_v3, 7 }
  0x2f   :  { %v119_v12 = vperm.slane %v104_v4, 0  ;;  %v127_v13 = vperm.slane %v111_v5, 0  ;;  %v270_v14 = vrot.slane %v573_v2, 6  ;;  %v277_v15 = vrot.slane %v575_v3, 6 }
  0x30   :  { %v159_v16 = vmul.f32 %v120_v8, %v563_v60  ;;  %v160_v17 = vmul.f32 %v120_v8, %v565_v61  ;;  %v175_v18 = vmul.f32 %v128_v9, %v563_v60  ;;  %v176_v19 = vmul.f32 %v128_v9, %v565_v61 }
  0x31   :  { %v286_v20 = vperm.slane %v271_v10, 0  ;;  %v294_v21 = vperm.slane %v278_v11, 0  ;;  %v157_v22 = vmul.f32 %v119_v12, %v563_v60  ;;  %v158_v23 = vmul.f32 %v119_v12, %v565_v61 }
  0x32   :  { %v185_v25 = vpack.c.bf16 %v160_v17, %v159_v16  ;;  %v193_v26 = vpack.c.bf16 %v176_v19, %v175_v18  ;;  %v173_v27 = vmul.f32 %v127_v13, %v563_v60  ;;  %v174_v28 = vmul.f32 %v127_v13, %v565_v61 }
  0x33   :  { %v325_v31 = vmul.f32 %v286_v20, %v567_v62  ;;  %v326_v32 = vmul.f32 %v286_v20, %v569_v63  ;;  %v341_v33 = vmul.f32 %v294_v21, %v567_v62  ;;  %v342_v34 = vmul.f32 %v294_v21, %v569_v63 }
  0x34   :  { %200 = vmatpush.bf16.msra.mxu0 %v185_v25  ;;  %213 = vmatpush.bf16.msra.mxu1 %v193_v26  ;;  %v184_v35 = vpack.c.bf16 %v158_v23, %v157_v22  ;;  %v192_v36 = vpack.c.bf16 %v174_v28, %v173_v27  ;;  %v285_v37 = vperm.slane %v270_v14, 0  ;;  %v293_v38 = vperm.slane %v277_v15, 0 }
  0x35   :  { %v352_v39 = vpack.c.bf16 %v326_v32, %v325_v31  ;;  %v360_v40 = vpack.c.bf16 %v342_v34, %v341_v33  ;;  %v118_v41 = vperm.slane %v103_v6, 0  ;;  %v126_v42 = vperm.slane %v110_v7, 0 }
  0x36   :  { %v323_v43 = vmul.f32 %v285_v37, %v567_v62  ;;  %v324_v44 = vmul.f32 %v285_v37, %v569_v63  ;;  %v339_v45 = vmul.f32 %v293_v38, %v567_v62  ;;  %v340_v46 = vmul.f32 %v293_v38, %v569_v63 }
  0x37   :  { %367 = vmatpush.bf16.msra.mxu2 %v352_v39  ;;  %380 = vmatpush.bf16.msra.mxu3 %v360_v40  ;;  %v155_v47 = vmul.f32 %v118_v41, %v563_v60  ;;  %v156_v48 = vmul.f32 %v118_v41, %v565_v61  ;;  %v171_v49 = vmul.f32 %v126_v42, %v563_v60  ;;  %v269_v50 = vrot.slane %v573_v2, 5 }
  0x38   :  { %201 = vmatpush.bf16.msra.mxu0 %v184_v35  ;;  %214 = vmatpush.bf16.msra.mxu1 %v192_v36  ;;  %v351_v51 = vpack.c.bf16 %v324_v44, %v323_v43  ;;  %v359_v52 = vpack.c.bf16 %v340_v46, %v339_v45  ;;  %v172_v53 = vmul.f32 %v126_v42, %v565_v61  ;;  %v276_v54 = vrot.slane %v575_v3, 5 }
  0x39   :  { %v183_v55 = vpack.c.bf16 %v156_v48, %v155_v47  ;;  %v284_v58 = vperm.slane %v269_v50, 0  ;;  %v102_v59 = vrot.slane %v559_v56, 4  ;;  %v109_v0 = vrot.slane %v561_v57, 4 }
  0x3a   :  { %v191_v1 = vpack.c.bf16 %v172_v53, %v171_v49  ;;  %v292_v4 = vperm.slane %v276_v54, 0  ;;  %v268_v5 = vrot.slane %v573_v2, 4  ;;  %v275_v6 = vrot.slane %v575_v3, 4 }
  0x3b   :  { %368 = vmatpush.bf16.msra.mxu2 %v351_v51  ;;  %381 = vmatpush.bf16.msra.mxu3 %v359_v52  ;;  %v321_v7 = vmul.f32 %v284_v58, %v567_v62  ;;  %v322_v8 = vmul.f32 %v284_v58, %v569_v63  ;;  %v117_v9 = vperm.slane %v102_v59, 0  ;;  %v125_v10 = vperm.slane %v109_v0, 0 }
  0x3c   :  { %202 = vmatpush.bf16.msra.mxu0 %v183_v55  ;;  %215 = vmatpush.bf16.msra.mxu1 %v191_v1  ;;  %v337_v11 = vmul.f32 %v292_v4, %v567_v62  ;;  %v338_v12 = vmul.f32 %v292_v4, %v569_v63  ;;  %v283_v13 = vperm.slane %v268_v5, 0  ;;  %v291_v14 = vperm.slane %v275_v6, 0 }
  0x3d   :  { %v350_v15 = vpack.c.bf16 %v322_v8, %v321_v7  ;;  %v153_v16 = vmul.f32 %v117_v9, %v563_v60  ;;  %v154_v17 = vmul.f32 %v117_v9, %v565_v61  ;;  %v169_v18 = vmul.f32 %v125_v10, %v563_v60 }
  0x3e   :  { %v358_v19 = vpack.c.bf16 %v338_v12, %v337_v11  ;;  %v170_v20 = vmul.f32 %v125_v10, %v565_v61  ;;  %v319_v21 = vmul.f32 %v283_v13, %v567_v62  ;;  %v320_v22 = vmul.f32 %v283_v13, %v569_v63 }
  0x3f   :  { %369 = vmatpush.bf16.msra.mxu2 %v350_v15  ;;  %v182_v23 = vpack.c.bf16 %v154_v17, %v153_v16  ;;  %v335_v25 = vmul.f32 %v291_v14, %v567_v62  ;;  %v336_v26 = vmul.f32 %v291_v14, %v569_v63  ;;  %v101_v27 = vrot.slane %v559_v56, 3 }
  0x40   :  { %382 = vmatpush.bf16.msra.mxu3 %v358_v19  ;;  %v190_v28 = vpack.c.bf16 %v170_v20, %v169_v18  ;;  %v349_v30 = vpack.c.bf16 %v320_v22, %v319_v21  ;;  %v108_v31 = vrot.slane %v561_v57, 3  ;;  %v267_v32 = vrot.slane %v573_v2, 3 }
  0x41   :  { %203 = vmatpush.bf16.msra.mxu0 %v182_v23  ;;  %v357_v33 = vpack.c.bf16 %v336_v26, %v335_v25  ;;  %v116_v34 = vperm.slane %v101_v27, 0  ;;  %v274_v35 = vrot.slane %v575_v3, 3  ;;  %v100_v36 = vrot.slane %v559_v56, 2 }
  0x42   :  { %216 = vmatpush.bf16.msra.mxu1 %v190_v28  ;;  %v124_v37 = vperm.slane %v108_v31, 0  ;;  %v282_v38 = vperm.slane %v267_v32, 0  ;;  %v107_v39 = vrot.slane %v561_v57, 2  ;;  %v266_v40 = vrot.slane %v573_v2, 2 }
  0x43   :  { %370 = vmatpush.bf16.msra.mxu2 %v349_v30  ;;  %v151_v41 = vmul.f32 %v116_v34, %v563_v60  ;;  %v152_v42 = vmul.f32 %v116_v34, %v565_v61  ;;  %v290_v43 = vperm.slane %v274_v35, 0  ;;  %v115_v44 = vperm.slane %v100_v36, 0 }
  0x44   :  { %383 = vmatpush.bf16.msra.mxu3 %v357_v33  ;;  %v167_v45 = vmul.f32 %v124_v37, %v563_v60  ;;  %v168_v46 = vmul.f32 %v124_v37, %v565_v61  ;;  %v317_v47 = vmul.f32 %v282_v38, %v567_v62  ;;  %v318_v48 = vmul.f32 %v282_v38, %v569_v63 }
  0x45   :  { %v181_v49 = vpack.c.bf16 %v152_v42, %v151_v41  ;;  %v333_v50 = vmul.f32 %v290_v43, %v567_v62  ;;  %v334_v51 = vmul.f32 %v290_v43, %v569_v63  ;;  %v149_v52 = vmul.f32 %v115_v44, %v563_v60 }
  0x46   :  { %v189_v53 = vpack.c.bf16 %v168_v46, %v167_v45  ;;  %v348_v54 = vpack.c.bf16 %v318_v48, %v317_v47  ;;  %v150_v55 = vmul.f32 %v115_v44, %v565_v61  ;;  %v123_v58 = vperm.slane %v107_v39, 0 }
  0x47   :  { %204 = vmatpush.bf16.msra.mxu0 %v181_v49  ;;  %v356_v59 = vpack.c.bf16 %v334_v51, %v333_v50  ;;  %v281_v0 = vperm.slane %v266_v40, 0  ;;  %v273_v1 = vrot.slane %v575_v3, 2  ;;  %v99_v4 = vrot.slane %v559_v56, 1 }
  0x48   :  { %217 = vmatpush.bf16.msra.mxu1 %v189_v53  ;;  %371 = vmatpush.bf16.msra.mxu2 %v348_v54  ;;  %v180_v5 = vpack.c.bf16 %v150_v55, %v149_v52  ;;  %v165_v6 = vmul.f32 %v123_v58, %v563_v60  ;;  %v166_v7 = vmul.f32 %v123_v58, %v565_v61  ;;  %v106_v8 = vrot.slane %v561_v57, 1 }
  0x49   :  { %384 = vmatpush.bf16.msra.mxu3 %v356_v59  ;;  %v315_v9 = vmul.f32 %v281_v0, %v567_v62  ;;  %v316_v10 = vmul.f32 %v281_v0, %v569_v63  ;;  %v289_v11 = vperm.slane %v273_v1, 0  ;;  %v114_v12 = vperm.slane %v99_v4, 0 }
  0x4a   :  { %v188_v13 = vpack.c.bf16 %v166_v7, %v165_v6  ;;  %v122_v14 = vperm.slane %v106_v8, 0  ;;  %v265_v15 = vrot.slane %v573_v2, 1  ;;  %v272_v16 = vrot.slane %v575_v3, 1 }
  0x4b   :  { %205 = vmatpush.bf16.msra.mxu0 %v180_v5  ;;  %v347_v17 = vpack.c.bf16 %v316_v10, %v315_v9  ;;  %v331_v18 = vmul.f32 %v289_v11, %v567_v62  ;;  %v332_v19 = vmul.f32 %v289_v11, %v569_v63  ;;  %v147_v20 = vmul.f32 %v114_v12, %v563_v60 }
  0x4c   :  { %218 = vmatpush.bf16.msra.mxu1 %v188_v13  ;;  %v148_v21 = vmul.f32 %v114_v12, %v565_v61  ;;  %v163_v22 = vmul.f32 %v122_v14, %v563_v60  ;;  %v164_v23 = vmul.f32 %v122_v14, %v565_v61  ;;  %v280_v25 = vperm.slane %v265_v15, 0 }
  0x4d   :  { %372 = vmatpush.bf16.msra.mxu2 %v347_v17  ;;  %v355_v26 = vpack.c.bf16 %v332_v19, %v331_v18  ;;  %v288_v27 = vperm.slane %v272_v16, 0  ;;  %v113_v28 = vperm.slane %v559_v56, 0  ;;  %v121_v30 = vperm.slane %v561_v57, 0 }
  0x4e   :  { %v179_v31 = vpack.c.bf16 %v148_v21, %v147_v20  ;;  %v187_v32 = vpack.c.bf16 %v164_v23, %v163_v22  ;;  %v313_v33 = vmul.f32 %v280_v25, %v567_v62  ;;  %v314_v34 = vmul.f32 %v280_v25, %v569_v63 }
  0x4f   :  { %385 = vmatpush.bf16.msra.mxu3 %v355_v26  ;;  %v329_v35 = vmul.f32 %v288_v27, %v567_v62  ;;  %v330_v36 = vmul.f32 %v288_v27, %v569_v63  ;;  %v145_v37 = vmul.f32 %v113_v28, %v563_v60  ;;  %v146_v38 = vmul.f32 %v113_v28, %v565_v61 }
  0x50   :  { %206 = vmatpush.bf16.msra.mxu0 %v179_v31  ;;  %219 = vmatpush.bf16.msra.mxu1 %v187_v32  ;;  %v346_v56 = vpack.c.bf16 %v314_v34, %v313_v33  ;;  %v161_v57 = vmul.f32 %v121_v30, %v563_v60  ;;  %v162_v39 = vmul.f32 %v121_v30, %v565_v61  ;;  %v279_v40 = vperm.slane %v573_v2, 0  ;;  %v363_v2 = vld.sshfl [vmem:[#allocation1] sm:$0xff pattern:$0x73625140] }
  0x51   :  { %v354_v41 = vpack.c.bf16 %v330_v36, %v329_v35  ;;  %v178_v42 = vpack.c.bf16 %v146_v38, %v145_v37  ;;  %v287_v43 = vperm.slane %v575_v3, 0  ;;  %v364_v3 = vld.sshfl [vmem:[#allocation1 + $0x8] sm:$0xff pattern:$0x73625140] }
  0x52   :  { %373 = vmatpush.bf16.msra.mxu2 %v346_v56  ;;  %v186_v44 = vpack.c.bf16 %v162_v39, %v161_v57  ;;  %v311_v45 = vmul.f32 %v279_v40, %v567_v62  ;;  %v312_v46 = vmul.f32 %v279_v40, %v569_v63 }
  0x53   :  { %386 = vmatpush.bf16.msra.mxu3 %v354_v41  ;;  %v327_v47 = vmul.f32 %v287_v43, %v567_v62  ;;  %v328_v48 = vmul.f32 %v287_v43, %v569_v63 }
  0x54   :  { %207 = vmatpush.bf16.msra.mxu0 %v178_v42  ;;  %220 = vmatpush.bf16.msra.mxu1 %v186_v44  ;;  %v345_v60 = vpack.c.bf16 %v312_v46, %v311_v45 }
  0x55   :  { %v353_v61 = vpack.c.bf16 %v328_v48, %v327_v47 }
  0x56   :  { %374 = vmatpush.bf16.msra.mxu2 %v345_v60 }
  0x57   :  { %387 = vmatpush.bf16.msra.mxu3 %v353_v61  ;;  %208 = vmatmul.bf16.vlgmr.msra.gmra.mxu0 %v591_v24 }
  0x58   :  { %221 = vmatmul.bf16.vlgmr.msra.gmra.mxu1 %v595_v29 }
  0x59   :  { %375 = vmatmul.bf16.vlgmr.msra.gmra.mxu2 %v363_v2 }
  0x5a   :  { %388 = vmatmul.bf16.vlgmr.msra.gmra.mxu3 %v364_v3 }
  0xd4   :  { %v209_v49 = vpop.f32.mrf.mxu0 }
  0xd5   :  { %v222_v50 = vpop.f32.mrf.mxu1 }
  0xd6   :  { %v223_v51 = vadd.f32 %v222_v50, %v209_v49 }
  0xd8   :  { %226 = vst [vmem:[#allocation9] sm:$0xf] %v223_v51 }
  0xdc   :  { %v376_v62 = vpop.f32.mrf.mxu2  ;;  %v211_v63 = vpop.f32.mrf.mxu0 }
  0xdd   :  { %v389_v52 = vpop.f32.mrf.mxu3  ;;  %v224_v53 = vpop.f32.mrf.mxu1 }
  0xde   :  { %v390_v24 = vadd.f32 %v389_v52, %v376_v62 }
  0xe0   :  { %394 = vst [vmem:[#allocation9 + $0x4] sm:$0xf] %v390_v24 }
  0xe1   :  { %407 = dma.vmem_to_hbm [thread:$0]  %s400_s30, 128, %s402_s6, [#allocation4], %s524_s0, %s524_s0, %s525_s26  }
  0xe4   :  { %v378_v29 = vpop.f32.mrf.mxu2 }
  0xe5   :  { %v391_v54 = vpop.f32.mrf.mxu3 }
  0xe6   :  { %519 = dma.done.wait [#allocation4], 128  }
  0xe7   :  { %520 = vsyncadd [#allocation4], 4294967168 }
  0xe8   :  { %412 = vsyncpa [#allocation3], 1 }
  0xe9   :  { %413 = vsyncpa [#allocation8], 1 }
  0xea   :  { %414 = vsyncpa [#allocation4], 1 }
  0xeb   :  { %415 = vsyncpa [#allocation5], 1 }

</bundles_post_ra>
